<compile_context>
chip_gen: v6e
topology: v6e:2x2x1
jax: 0.10.0
libtpu: 0.0.40
codegen_flags: <defaults>
</compile_context>

<pallas_src>
import numpy as np
import jax
import jax.numpy as jnp
from jax.experimental import pallas as pl
from jax.experimental.pallas import tpu as pltpu


# ----------------------------------------------------------------------------
# Primary path: aliased output, no data movement at all.
# ----------------------------------------------------------------------------
def _contiguous_alias_kernel(x_hbm_ref, o_hbm_ref):
    # Output buffer is aliased to the input (input_output_aliases={0: 0}), so
    # the data is already in place.  No DMA, no VMEM, no compute: just a fake
    # read+write dependency so the aliased output counts as produced here.
    del x_hbm_ref
    pltpu.touch(o_hbm_ref)


def _contiguous_aliased(x: jax.Array) -> jax.Array:
    return pl.pallas_call(
        _contiguous_alias_kernel,
        out_shape=jax.ShapeDtypeStruct(x.shape, x.dtype),
        in_specs=[pl.BlockSpec(memory_space=pl.ANY)],
        out_specs=pl.BlockSpec(memory_space=pl.ANY),
        input_output_aliases={0: 0},
        cost_estimate=pl.CostEstimate(flops=0, transcendentals=0,
                                      bytes_accessed=0),
    )(x)


# ----------------------------------------------------------------------------
# Fallback path: one whole-array HBM->HBM DMA (no grid, no VMEM staging).
# Only used if the aliased/no-DMA variant fails to lower on this jax version.
# ----------------------------------------------------------------------------
def _contiguous_dma_kernel(x_hbm_ref, o_hbm_ref, copy_sem):
    cp = pltpu.make_async_copy(x_hbm_ref, o_hbm_ref, copy_sem)
    cp.start()
    cp.wait()


def _contiguous_copy(x: jax.Array) -> jax.Array:
    nbytes = 2 * x.size * jnp.dtype(x.dtype).itemsize  # one read + one write
    return pl.pallas_call(
        _contiguous_dma_kernel,
        out_shape=jax.ShapeDtypeStruct(x.shape, x.dtype),
        in_specs=[pl.BlockSpec(memory_space=pl.ANY)],
        out_specs=pl.BlockSpec(memory_space=pl.ANY),
        scratch_shapes=[pltpu.SemaphoreType.DMA(())],
        cost_estimate=pl.CostEstimate(flops=0, transcendentals=0,
                                      bytes_accessed=nbytes),
    )(x)


def contiguous_pallas(x: jax.Array) -> jax.Array:
    """torch.Tensor.contiguous() equivalent: identity on values/shape/dtype."""
    try:
        out = _contiguous_aliased(x)
        jax.block_until_ready(out)
        return out
    except Exception:
        # Robust fallback: single-DMA materialized copy (previous clean kernel).
        return _contiguous_copy(x)


if __name__ == "__main__":
    key = jax.random.PRNGKey(0)
    # Shape implied by the module: torch.randn([24, 49, 49]) (~230 KB of f32).
    x562 = jax.random.normal(key, (24, 49, 49), dtype=jnp.float32)

    # Host snapshot for the correctness check (input buffer may be aliased).
    x_expected = np.asarray(x562)

    x563 = contiguous_pallas(x562)
    jax.block_until_ready(x563)

    # Sanity check: contiguous() is an identity op on values.
    assert x563.shape == x_expected.shape
    assert x563.dtype == jnp.float32
    assert bool(jnp.array_equal(x563, jnp.asarray(x_expected)))

    print("KERNEL_OK")
</pallas_src>

<mosaic_0001>
module attributes {stable_mosaic.version = 11 : i64} {
  func.func @_contiguous_alias_kernel(%arg0: memref<24x49x49xf32, #tpu.memory_space<any>>, %arg1: memref<24x49x49xf32, #tpu.memory_space<any>>) attributes {dimension_semantics = [], scalar_prefetch = 0 : i64, scratch_operands = 0 : i64, tpu.core_type = #tpu.core_type<tc>} {
    return
  }
}

module attributes {stable_mosaic.version = 11 : i64} {
  func.func @_contiguous_dma_kernel(%arg0: memref<24x49x49xf32, #tpu.memory_space<any>>, %arg1: memref<24x49x49xf32, #tpu.memory_space<any>>, %arg2: memref<!tpu.dma_semaphore, #tpu.memory_space<semaphore_mem>>) attributes {dimension_semantics = [], scalar_prefetch = 0 : i64, scratch_operands = 1 : i64, tpu.core_type = #tpu.core_type<tc>} {
    tpu.enqueue_dma source(%arg0 : memref<24x49x49xf32, #tpu.memory_space<any>>) target(%arg1 : memref<24x49x49xf32, #tpu.memory_space<any>>) target_semaphore(%arg2 : memref<!tpu.dma_semaphore, #tpu.memory_space<semaphore_mem>>)
    tpu.wait_dma2 semaphore(%arg2 : memref<!tpu.dma_semaphore, #tpu.memory_space<semaphore_mem>>) src(%arg0 : memref<24x49x49xf32, #tpu.memory_space<any>>) dst(%arg1 : memref<24x49x49xf32, #tpu.memory_space<any>>)
    return
  }
}

</mosaic_0001>

<bundles_post_ra>
// kernel: tpu_custom_call.1
= control target key start
LH: loop header
LB: loop body
LE: loop exit
PB: predicated region body
PF: predicated region fallthrough
CT: control target
= control target key end

     0   :  { %s16_s0 = inlined_call_operand.vmem [shape: f32[24,49,49], index: 0, kind: input, shape index: {}, may-alias: {0,1}]   ;;  %s17_s1 = inlined_call_operand.vmem [shape: f32[24,49,49], index: 1, kind: output, shape index: {}, may-alias: {0,1}]  }

// kernel: tpu_custom_call.1
= control target key start
LH: loop header
LB: loop body
LE: loop exit
PB: predicated region body
PF: predicated region fallthrough
CT: control target
= control target key end

     0   :  { %s1533_s0 = inlined_call_operand.vmem [shape: f32[24,49,49], index: 0, kind: input, shape index: {}]   ;;  %s1534_s1 = inlined_call_operand.vmem [shape: f32[24,49,49], index: 1, kind: output, shape index: {}]  }
   0x1   :  { %v90_v0 = vld [vmem:[%s1533_s0] sm:$0xff]  ;;  %v92_v1 = vld [vmem:[%s1533_s0 + $0x8] sm:$0xff]  ;;  %v94_v2 = vld [vmem:[%s1533_s0 + $0x10] sm:$0xff] }
   0x2   :  { %91 = vst [vmem:[%s1534_s1] sm:$0xff] %v90_v0  ;;  %93 = vst [vmem:[%s1534_s1 + $0x8] sm:$0xff] %v92_v1  ;;  %v96_v3 = vld [vmem:[%s1533_s0 + $0x18] sm:$0xff]  ;;  %v98_v4 = vld [vmem:[%s1533_s0 + $0x20] sm:$0xff] }
   0x3   :  { %95 = vst [vmem:[%s1534_s1 + $0x10] sm:$0xff] %v94_v2  ;;  %v100_v5 = vld [vmem:[%s1533_s0 + $0x28] sm:$0xff]  ;;  %97 = vst [vmem:[%s1534_s1 + $0x18] sm:$0xff] %v96_v3  ;;  %v102_v6 = vld [vmem:[%s1533_s0 + $0x38] sm:$0xff] }
   0x4   :  { %99 = vst [vmem:[%s1534_s1 + $0x20] sm:$0xff] %v98_v4  ;;  %101 = vst [vmem:[%s1534_s1 + $0x28] sm:$0xff] %v100_v5  ;;  %v104_v7 = vld [vmem:[%s1533_s0 + $0x40] sm:$0xff]  ;;  %v106_v8 = vld [vmem:[%s1533_s0 + $0x48] sm:$0xff] }
   0x5   :  { %103 = vst [vmem:[%s1534_s1 + $0x38] sm:$0xff] %v102_v6  ;;  %105 = vst [vmem:[%s1534_s1 + $0x40] sm:$0xff] %v104_v7  ;;  %v108_v9 = vld [vmem:[%s1533_s0 + $0x50] sm:$0xff]  ;;  %v110_v10 = vld [vmem:[%s1533_s0 + $0x58] sm:$0xff] }
   0x6   :  { %107 = vst [vmem:[%s1534_s1 + $0x48] sm:$0xff] %v106_v8  ;;  %v112_v11 = vld [vmem:[%s1533_s0 + $0x60] sm:$0xff]  ;;  %109 = vst [vmem:[%s1534_s1 + $0x50] sm:$0xff] %v108_v9  ;;  %v114_v12 = vld [vmem:[%s1533_s0 + $0x70] sm:$0xff] }
   0x7   :  { %111 = vst [vmem:[%s1534_s1 + $0x58] sm:$0xff] %v110_v10  ;;  %113 = vst [vmem:[%s1534_s1 + $0x60] sm:$0xff] %v112_v11  ;;  %v116_v13 = vld [vmem:[%s1533_s0 + $0x78] sm:$0xff]  ;;  %v118_v14 = vld [vmem:[%s1533_s0 + $0x80] sm:$0xff] }
   0x8   :  { %115 = vst [vmem:[%s1534_s1 + $0x70] sm:$0xff] %v114_v12  ;;  %117 = vst [vmem:[%s1534_s1 + $0x78] sm:$0xff] %v116_v13  ;;  %v120_v15 = vld [vmem:[%s1533_s0 + $0x88] sm:$0xff]  ;;  %v122_v16 = vld [vmem:[%s1533_s0 + $0x90] sm:$0xff] }
   0x9   :  { %119 = vst [vmem:[%s1534_s1 + $0x80] sm:$0xff] %v118_v14  ;;  %v124_v17 = vld [vmem:[%s1533_s0 + $0x98] sm:$0xff]  ;;  %121 = vst [vmem:[%s1534_s1 + $0x88] sm:$0xff] %v120_v15  ;;  %v126_v18 = vld [vmem:[%s1533_s0 + $0xa8] sm:$0xff] }
   0xa   :  { %123 = vst [vmem:[%s1534_s1 + $0x90] sm:$0xff] %v122_v16  ;;  %125 = vst [vmem:[%s1534_s1 + $0x98] sm:$0xff] %v124_v17  ;;  %v128_v19 = vld [vmem:[%s1533_s0 + $0xb0] sm:$0xff]  ;;  %v130_v20 = vld [vmem:[%s1533_s0 + $0xb8] sm:$0xff] }
   0xb   :  { %127 = vst [vmem:[%s1534_s1 + $0xa8] sm:$0xff] %v126_v18  ;;  %129 = vst [vmem:[%s1534_s1 + $0xb0] sm:$0xff] %v128_v19  ;;  %v132_v21 = vld [vmem:[%s1533_s0 + $0xc0] sm:$0xff]  ;;  %v134_v22 = vld [vmem:[%s1533_s0 + $0xc8] sm:$0xff] }
   0xc   :  { %131 = vst [vmem:[%s1534_s1 + $0xb8] sm:$0xff] %v130_v20  ;;  %v136_v23 = vld [vmem:[%s1533_s0 + $0xd0] sm:$0xff]  ;;  %133 = vst [vmem:[%s1534_s1 + $0xc0] sm:$0xff] %v132_v21  ;;  %v138_v24 = vld [vmem:[%s1533_s0 + $0xe0] sm:$0xff] }
   0xd   :  { %135 = vst [vmem:[%s1534_s1 + $0xc8] sm:$0xff] %v134_v22  ;;  %137 = vst [vmem:[%s1534_s1 + $0xd0] sm:$0xff] %v136_v23  ;;  %v140_v25 = vld [vmem:[%s1533_s0 + $0xe8] sm:$0xff]  ;;  %v142_v26 = vld [vmem:[%s1533_s0 + $0xf0] sm:$0xff] }
   0xe   :  { %139 = vst [vmem:[%s1534_s1 + $0xe0] sm:$0xff] %v138_v24  ;;  %141 = vst [vmem:[%s1534_s1 + $0xe8] sm:$0xff] %v140_v25  ;;  %v144_v27 = vld [vmem:[%s1533_s0 + $0xf8] sm:$0xff]  ;;  %v146_v28 = vld [vmem:[%s1533_s0 + $0x100] sm:$0xff] }
   0xf   :  { %143 = vst [vmem:[%s1534_s1 + $0xf0] sm:$0xff] %v142_v26  ;;  %v148_v29 = vld [vmem:[%s1533_s0 + $0x108] sm:$0xff]  ;;  %145 = vst [vmem:[%s1534_s1 + $0xf8] sm:$0xff] %v144_v27  ;;  %v150_v30 = vld [vmem:[%s1533_s0 + $0x118] sm:$0xff] }
  0x10   :  { %147 = vst [vmem:[%s1534_s1 + $0x100] sm:$0xff] %v146_v28  ;;  %149 = vst [vmem:[%s1534_s1 + $0x108] sm:$0xff] %v148_v29  ;;  %v152_v31 = vld [vmem:[%s1533_s0 + $0x120] sm:$0xff]  ;;  %v154_v32 = vld [vmem:[%s1533_s0 + $0x128] sm:$0xff] }
  0x11   :  { %151 = vst [vmem:[%s1534_s1 + $0x118] sm:$0xff] %v150_v30  ;;  %153 = vst [vmem:[%s1534_s1 + $0x120] sm:$0xff] %v152_v31  ;;  %v156_v33 = vld [vmem:[%s1533_s0 + $0x130] sm:$0xff]  ;;  %v158_v34 = vld [vmem:[%s1533_s0 + $0x138] sm:$0xff] }
  0x12   :  { %155 = vst [vmem:[%s1534_s1 + $0x128] sm:$0xff] %v154_v32  ;;  %v160_v35 = vld [vmem:[%s1533_s0 + $0x140] sm:$0xff]  ;;  %157 = vst [vmem:[%s1534_s1 + $0x130] sm:$0xff] %v156_v33  ;;  %v162_v36 = vld [vmem:[%s1533_s0 + $0x150] sm:$0xff] }
  0x13   :  { %159 = vst [vmem:[%s1534_s1 + $0x138] sm:$0xff] %v158_v34  ;;  %161 = vst [vmem:[%s1534_s1 + $0x140] sm:$0xff] %v160_v35  ;;  %v164_v37 = vld [vmem:[%s1533_s0 + $0x158] sm:$0xff]  ;;  %v166_v38 = vld [vmem:[%s1533_s0 + $0x160] sm:$0xff] }
  0x14   :  { %163 = vst [vmem:[%s1534_s1 + $0x150] sm:$0xff] %v162_v36  ;;  %165 = vst [vmem:[%s1534_s1 + $0x158] sm:$0xff] %v164_v37  ;;  %v168_v39 = vld [vmem:[%s1533_s0 + $0x168] sm:$0xff]  ;;  %v170_v40 = vld [vmem:[%s1533_s0 + $0x170] sm:$0xff] }
  0x15   :  { %167 = vst [vmem:[%s1534_s1 + $0x160] sm:$0xff] %v166_v38  ;;  %v172_v41 = vld [vmem:[%s1533_s0 + $0x178] sm:$0xff]  ;;  %169 = vst [vmem:[%s1534_s1 + $0x168] sm:$0xff] %v168_v39  ;;  %v174_v42 = vld [vmem:[%s1533_s0 + $0x188] sm:$0xff] }
  0x16   :  { %171 = vst [vmem:[%s1534_s1 + $0x170] sm:$0xff] %v170_v40  ;;  %173 = vst [vmem:[%s1534_s1 + $0x178] sm:$0xff] %v172_v41  ;;  %v176_v43 = vld [vmem:[%s1533_s0 + $0x190] sm:$0xff]  ;;  %v178_v44 = vld [vmem:[%s1533_s0 + $0x198] sm:$0xff] }
  0x17   :  { %175 = vst [vmem:[%s1534_s1 + $0x188] sm:$0xff] %v174_v42  ;;  %177 = vst [vmem:[%s1534_s1 + $0x190] sm:$0xff] %v176_v43  ;;  %v180_v45 = vld [vmem:[%s1533_s0 + $0x1a0] sm:$0xff]  ;;  %v182_v46 = vld [vmem:[%s1533_s0 + $0x1a8] sm:$0xff] }
  0x18   :  { %179 = vst [vmem:[%s1534_s1 + $0x198] sm:$0xff] %v178_v44  ;;  %v184_v47 = vld [vmem:[%s1533_s0 + $0x1b0] sm:$0xff]  ;;  %181 = vst [vmem:[%s1534_s1 + $0x1a0] sm:$0xff] %v180_v45  ;;  %v186_v48 = vld [vmem:[%s1533_s0 + $0x1c0] sm:$0xff] }
  0x19   :  { %183 = vst [vmem:[%s1534_s1 + $0x1a8] sm:$0xff] %v182_v46  ;;  %185 = vst [vmem:[%s1534_s1 + $0x1b0] sm:$0xff] %v184_v47  ;;  %v188_v49 = vld [vmem:[%s1533_s0 + $0x1c8] sm:$0xff]  ;;  %v190_v50 = vld [vmem:[%s1533_s0 + $0x1d0] sm:$0xff] }
  0x1a   :  { %187 = vst [vmem:[%s1534_s1 + $0x1c0] sm:$0xff] %v186_v48  ;;  %189 = vst [vmem:[%s1534_s1 + $0x1c8] sm:$0xff] %v188_v49  ;;  %v192_v51 = vld [vmem:[%s1533_s0 + $0x1d8] sm:$0xff]  ;;  %v194_v52 = vld [vmem:[%s1533_s0 + $0x1e0] sm:$0xff] }
  0x1b   :  { %191 = vst [vmem:[%s1534_s1 + $0x1d0] sm:$0xff] %v190_v50  ;;  %v196_v53 = vld [vmem:[%s1533_s0 + $0x1e8] sm:$0xff]  ;;  %193 = vst [vmem:[%s1534_s1 + $0x1d8] sm:$0xff] %v192_v51  ;;  %v198_v54 = vld [vmem:[%s1533_s0 + $0x1f8] sm:$0xff] }
  0x1c   :  { %195 = vst [vmem:[%s1534_s1 + $0x1e0] sm:$0xff] %v194_v52  ;;  %197 = vst [vmem:[%s1534_s1 + $0x1e8] sm:$0xff] %v196_v53  ;;  %v200_v55 = vld [vmem:[%s1533_s0 + $0x200] sm:$0xff]  ;;  %v202_v56 = vld [vmem:[%s1533_s0 + $0x208] sm:$0xff] }
  0x1d   :  { %199 = vst [vmem:[%s1534_s1 + $0x1f8] sm:$0xff] %v198_v54  ;;  %201 = vst [vmem:[%s1534_s1 + $0x200] sm:$0xff] %v200_v55  ;;  %v204_v57 = vld [vmem:[%s1533_s0 + $0x210] sm:$0xff]  ;;  %v206_v58 = vld [vmem:[%s1533_s0 + $0x218] sm:$0xff] }
  0x1e   :  { %203 = vst [vmem:[%s1534_s1 + $0x208] sm:$0xff] %v202_v56  ;;  %v208_v59 = vld [vmem:[%s1533_s0 + $0x220] sm:$0xff]  ;;  %205 = vst [vmem:[%s1534_s1 + $0x210] sm:$0xff] %v204_v57  ;;  %v210_v60 = vld [vmem:[%s1533_s0 + $0x230] sm:$0xff] }
  0x1f   :  { %207 = vst [vmem:[%s1534_s1 + $0x218] sm:$0xff] %v206_v58  ;;  %209 = vst [vmem:[%s1534_s1 + $0x220] sm:$0xff] %v208_v59  ;;  %v212_v61 = vld [vmem:[%s1533_s0 + $0x238] sm:$0xff]  ;;  %v214_v62 = vld [vmem:[%s1533_s0 + $0x240] sm:$0xff] }
  0x20   :  { %211 = vst [vmem:[%s1534_s1 + $0x230] sm:$0xff] %v210_v60  ;;  %213 = vst [vmem:[%s1534_s1 + $0x238] sm:$0xff] %v212_v61  ;;  %v216_v63 = vld [vmem:[%s1533_s0 + $0x248] sm:$0xff]  ;;  %v218_v0 = vld [vmem:[%s1533_s0 + $0x250] sm:$0xff] }
  0x21   :  { %215 = vst [vmem:[%s1534_s1 + $0x240] sm:$0xff] %v214_v62  ;;  %v220_v1 = vld [vmem:[%s1533_s0 + $0x258] sm:$0xff]  ;;  %217 = vst [vmem:[%s1534_s1 + $0x248] sm:$0xff] %v216_v63  ;;  %v222_v2 = vld [vmem:[%s1533_s0 + $0x268] sm:$0xff] }
  0x22   :  { %219 = vst [vmem:[%s1534_s1 + $0x250] sm:$0xff] %v218_v0  ;;  %221 = vst [vmem:[%s1534_s1 + $0x258] sm:$0xff] %v220_v1  ;;  %v224_v3 = vld [vmem:[%s1533_s0 + $0x270] sm:$0xff]  ;;  %v226_v4 = vld [vmem:[%s1533_s0 + $0x278] sm:$0xff] }
  0x23   :  { %223 = vst [vmem:[%s1534_s1 + $0x268] sm:$0xff] %v222_v2  ;;  %225 = vst [vmem:[%s1534_s1 + $0x270] sm:$0xff] %v224_v3  ;;  %v228_v5 = vld [vmem:[%s1533_s0 + $0x280] sm:$0xff]  ;;  %v230_v6 = vld [vmem:[%s1533_s0 + $0x288] sm:$0xff] }
  0x24   :  { %227 = vst [vmem:[%s1534_s1 + $0x278] sm:$0xff] %v226_v4  ;;  %v232_v7 = vld [vmem:[%s1533_s0 + $0x290] sm:$0xff]  ;;  %229 = vst [vmem:[%s1534_s1 + $0x280] sm:$0xff] %v228_v5  ;;  %v234_v8 = vld [vmem:[%s1533_s0 + $0x2a0] sm:$0xff] }
  0x25   :  { %231 = vst [vmem:[%s1534_s1 + $0x288] sm:$0xff] %v230_v6  ;;  %233 = vst [vmem:[%s1534_s1 + $0x290] sm:$0xff] %v232_v7  ;;  %v236_v9 = vld [vmem:[%s1533_s0 + $0x2a8] sm:$0xff]  ;;  %v238_v10 = vld [vmem:[%s1533_s0 + $0x2b0] sm:$0xff] }
  0x26   :  { %235 = vst [vmem:[%s1534_s1 + $0x2a0] sm:$0xff] %v234_v8  ;;  %237 = vst [vmem:[%s1534_s1 + $0x2a8] sm:$0xff] %v236_v9  ;;  %v240_v11 = vld [vmem:[%s1533_s0 + $0x2b8] sm:$0xff]  ;;  %v242_v12 = vld [vmem:[%s1533_s0 + $0x2c0] sm:$0xff] }
  0x27   :  { %239 = vst [vmem:[%s1534_s1 + $0x2b0] sm:$0xff] %v238_v10  ;;  %v244_v13 = vld [vmem:[%s1533_s0 + $0x2c8] sm:$0xff]  ;;  %241 = vst [vmem:[%s1534_s1 + $0x2b8] sm:$0xff] %v240_v11  ;;  %v246_v14 = vld [vmem:[%s1533_s0 + $0x2d8] sm:$0xff] }
  0x28   :  { %243 = vst [vmem:[%s1534_s1 + $0x2c0] sm:$0xff] %v242_v12  ;;  %245 = vst [vmem:[%s1534_s1 + $0x2c8] sm:$0xff] %v244_v13  ;;  %v248_v15 = vld [vmem:[%s1533_s0 + $0x2e0] sm:$0xff]  ;;  %v250_v16 = vld [vmem:[%s1533_s0 + $0x2e8] sm:$0xff] }
  0x29   :  { %247 = vst [vmem:[%s1534_s1 + $0x2d8] sm:$0xff] %v246_v14  ;;  %249 = vst [vmem:[%s1534_s1 + $0x2e0] sm:$0xff] %v248_v15  ;;  %v252_v17 = vld [vmem:[%s1533_s0 + $0x2f0] sm:$0xff]  ;;  %v254_v18 = vld [vmem:[%s1533_s0 + $0x2f8] sm:$0xff] }
  0x2a   :  { %251 = vst [vmem:[%s1534_s1 + $0x2e8] sm:$0xff] %v250_v16  ;;  %v256_v19 = vld [vmem:[%s1533_s0 + $0x300] sm:$0xff]  ;;  %253 = vst [vmem:[%s1534_s1 + $0x2f0] sm:$0xff] %v252_v17  ;;  %v258_v20 = vld [vmem:[%s1533_s0 + $0x310] sm:$0xff] }
  0x2b   :  { %255 = vst [vmem:[%s1534_s1 + $0x2f8] sm:$0xff] %v254_v18  ;;  %257 = vst [vmem:[%s1534_s1 + $0x300] sm:$0xff] %v256_v19  ;;  %v260_v21 = vld [vmem:[%s1533_s0 + $0x318] sm:$0xff]  ;;  %v262_v22 = vld [vmem:[%s1533_s0 + $0x320] sm:$0xff] }
  0x2c   :  { %259 = vst [vmem:[%s1534_s1 + $0x310] sm:$0xff] %v258_v20  ;;  %261 = vst [vmem:[%s1534_s1 + $0x318] sm:$0xff] %v260_v21  ;;  %v264_v23 = vld [vmem:[%s1533_s0 + $0x328] sm:$0xff]  ;;  %v266_v24 = vld [vmem:[%s1533_s0 + $0x330] sm:$0xff] }
  0x2d   :  { %263 = vst [vmem:[%s1534_s1 + $0x320] sm:$0xff] %v262_v22  ;;  %v268_v25 = vld [vmem:[%s1533_s0 + $0x338] sm:$0xff]  ;;  %265 = vst [vmem:[%s1534_s1 + $0x328] sm:$0xff] %v264_v23  ;;  %v270_v26 = vld [vmem:[%s1533_s0 + $0x348] sm:$0xff] }
  0x2e   :  { %267 = vst [vmem:[%s1534_s1 + $0x330] sm:$0xff] %v266_v24  ;;  %269 = vst [vmem:[%s1534_s1 + $0x338] sm:$0xff] %v268_v25  ;;  %v272_v27 = vld [vmem:[%s1533_s0 + $0x350] sm:$0xff]  ;;  %v274_v28 = vld [vmem:[%s1533_s0 + $0x358] sm:$0xff] }
  0x2f   :  { %271 = vst [vmem:[%s1534_s1 + $0x348] sm:$0xff] %v270_v26  ;;  %273 = vst [vmem:[%s1534_s1 + $0x350] sm:$0xff] %v272_v27  ;;  %v276_v29 = vld [vmem:[%s1533_s0 + $0x360] sm:$0xff]  ;;  %v278_v30 = vld [vmem:[%s1533_s0 + $0x368] sm:$0xff] }
  0x30   :  { %275 = vst [vmem:[%s1534_s1 + $0x358] sm:$0xff] %v274_v28  ;;  %v280_v31 = vld [vmem:[%s1533_s0 + $0x370] sm:$0xff]  ;;  %277 = vst [vmem:[%s1534_s1 + $0x360] sm:$0xff] %v276_v29  ;;  %v282_v32 = vld [vmem:[%s1533_s0 + $0x380] sm:$0xff] }
  0x31   :  { %279 = vst [vmem:[%s1534_s1 + $0x368] sm:$0xff] %v278_v30  ;;  %281 = vst [vmem:[%s1534_s1 + $0x370] sm:$0xff] %v280_v31  ;;  %v284_v33 = vld [vmem:[%s1533_s0 + $0x388] sm:$0xff]  ;;  %v286_v34 = vld [vmem:[%s1533_s0 + $0x390] sm:$0xff] }
  0x32   :  { %283 = vst [vmem:[%s1534_s1 + $0x380] sm:$0xff] %v282_v32  ;;  %285 = vst [vmem:[%s1534_s1 + $0x388] sm:$0xff] %v284_v33  ;;  %v288_v35 = vld [vmem:[%s1533_s0 + $0x398] sm:$0xff]  ;;  %v290_v36 = vld [vmem:[%s1533_s0 + $0x3a0] sm:$0xff] }
  0x33   :  { %287 = vst [vmem:[%s1534_s1 + $0x390] sm:$0xff] %v286_v34  ;;  %v292_v37 = vld [vmem:[%s1533_s0 + $0x3a8] sm:$0xff]  ;;  %289 = vst [vmem:[%s1534_s1 + $0x398] sm:$0xff] %v288_v35  ;;  %v294_v38 = vld [vmem:[%s1533_s0 + $0x3b8] sm:$0xff] }
  0x34   :  { %291 = vst [vmem:[%s1534_s1 + $0x3a0] sm:$0xff] %v290_v36  ;;  %293 = vst [vmem:[%s1534_s1 + $0x3a8] sm:$0xff] %v292_v37  ;;  %v296_v39 = vld [vmem:[%s1533_s0 + $0x3c0] sm:$0xff]  ;;  %v298_v40 = vld [vmem:[%s1533_s0 + $0x3c8] sm:$0xff] }
  0x35   :  { %295 = vst [vmem:[%s1534_s1 + $0x3b8] sm:$0xff] %v294_v38  ;;  %297 = vst [vmem:[%s1534_s1 + $0x3c0] sm:$0xff] %v296_v39  ;;  %v300_v41 = vld [vmem:[%s1533_s0 + $0x3d0] sm:$0xff]  ;;  %v302_v42 = vld [vmem:[%s1533_s0 + $0x3d8] sm:$0xff] }
  0x36   :  { %299 = vst [vmem:[%s1534_s1 + $0x3c8] sm:$0xff] %v298_v40  ;;  %v304_v43 = vld [vmem:[%s1533_s0 + $0x3e0] sm:$0xff]  ;;  %301 = vst [vmem:[%s1534_s1 + $0x3d0] sm:$0xff] %v300_v41  ;;  %v306_v44 = vld [vmem:[%s1533_s0 + $0x3f0] sm:$0xff] }
  0x37   :  { %303 = vst [vmem:[%s1534_s1 + $0x3d8] sm:$0xff] %v302_v42  ;;  %305 = vst [vmem:[%s1534_s1 + $0x3e0] sm:$0xff] %v304_v43  ;;  %v308_v45 = vld [vmem:[%s1533_s0 + $0x3f8] sm:$0xff]  ;;  %v310_v46 = vld [vmem:[%s1533_s0 + $0x400] sm:$0xff] }
  0x38   :  { %307 = vst [vmem:[%s1534_s1 + $0x3f0] sm:$0xff] %v306_v44  ;;  %309 = vst [vmem:[%s1534_s1 + $0x3f8] sm:$0xff] %v308_v45  ;;  %v312_v47 = vld [vmem:[%s1533_s0 + $0x408] sm:$0xff]  ;;  %v314_v48 = vld [vmem:[%s1533_s0 + $0x410] sm:$0xff] }
  0x39   :  { %311 = vst [vmem:[%s1534_s1 + $0x400] sm:$0xff] %v310_v46  ;;  %v316_v49 = vld [vmem:[%s1533_s0 + $0x418] sm:$0xff]  ;;  %313 = vst [vmem:[%s1534_s1 + $0x408] sm:$0xff] %v312_v47  ;;  %v318_v50 = vld [vmem:[%s1533_s0 + $0x428] sm:$0xff] }
  0x3a   :  { %315 = vst [vmem:[%s1534_s1 + $0x410] sm:$0xff] %v314_v48  ;;  %317 = vst [vmem:[%s1534_s1 + $0x418] sm:$0xff] %v316_v49  ;;  %v320_v51 = vld [vmem:[%s1533_s0 + $0x430] sm:$0xff]  ;;  %v322_v52 = vld [vmem:[%s1533_s0 + $0x438] sm:$0xff] }
  0x3b   :  { %319 = vst [vmem:[%s1534_s1 + $0x428] sm:$0xff] %v318_v50  ;;  %321 = vst [vmem:[%s1534_s1 + $0x430] sm:$0xff] %v320_v51  ;;  %v324_v53 = vld [vmem:[%s1533_s0 + $0x440] sm:$0xff]  ;;  %v326_v54 = vld [vmem:[%s1533_s0 + $0x448] sm:$0xff] }
  0x3c   :  { %323 = vst [vmem:[%s1534_s1 + $0x438] sm:$0xff] %v322_v52  ;;  %v328_v55 = vld [vmem:[%s1533_s0 + $0x450] sm:$0xff]  ;;  %325 = vst [vmem:[%s1534_s1 + $0x440] sm:$0xff] %v324_v53  ;;  %v330_v56 = vld [vmem:[%s1533_s0 + $0x460] sm:$0xff] }
  0x3d   :  { %327 = vst [vmem:[%s1534_s1 + $0x448] sm:$0xff] %v326_v54  ;;  %329 = vst [vmem:[%s1534_s1 + $0x450] sm:$0xff] %v328_v55  ;;  %v332_v57 = vld [vmem:[%s1533_s0 + $0x468] sm:$0xff]  ;;  %v334_v58 = vld [vmem:[%s1533_s0 + $0x470] sm:$0xff] }
  0x3e   :  { %331 = vst [vmem:[%s1534_s1 + $0x460] sm:$0xff] %v330_v56  ;;  %333 = vst [vmem:[%s1534_s1 + $0x468] sm:$0xff] %v332_v57  ;;  %v336_v59 = vld [vmem:[%s1533_s0 + $0x478] sm:$0xff]  ;;  %v338_v60 = vld [vmem:[%s1533_s0 + $0x480] sm:$0xff] }
  0x3f   :  { %335 = vst [vmem:[%s1534_s1 + $0x470] sm:$0xff] %v334_v58  ;;  %v340_v61 = vld [vmem:[%s1533_s0 + $0x488] sm:$0xff]  ;;  %337 = vst [vmem:[%s1534_s1 + $0x478] sm:$0xff] %v336_v59  ;;  %v342_v62 = vld [vmem:[%s1533_s0 + $0x498] sm:$0xff] }
  0x40   :  { %339 = vst [vmem:[%s1534_s1 + $0x480] sm:$0xff] %v338_v60  ;;  %341 = vst [vmem:[%s1534_s1 + $0x488] sm:$0xff] %v340_v61  ;;  %v344_v63 = vld [vmem:[%s1533_s0 + $0x4a0] sm:$0xff]  ;;  %v346_v0 = vld [vmem:[%s1533_s0 + $0x4a8] sm:$0xff] }
  0x41   :  { %343 = vst [vmem:[%s1534_s1 + $0x498] sm:$0xff] %v342_v62  ;;  %345 = vst [vmem:[%s1534_s1 + $0x4a0] sm:$0xff] %v344_v63  ;;  %v348_v1 = vld [vmem:[%s1533_s0 + $0x4b0] sm:$0xff]  ;;  %v350_v2 = vld [vmem:[%s1533_s0 + $0x4b8] sm:$0xff] }
  0x42   :  { %347 = vst [vmem:[%s1534_s1 + $0x4a8] sm:$0xff] %v346_v0  ;;  %v352_v3 = vld [vmem:[%s1533_s0 + $0x4c0] sm:$0xff]  ;;  %349 = vst [vmem:[%s1534_s1 + $0x4b0] sm:$0xff] %v348_v1  ;;  %v354_v4 = vld [vmem:[%s1533_s0 + $0x4d0] sm:$0xff] }
  0x43   :  { %351 = vst [vmem:[%s1534_s1 + $0x4b8] sm:$0xff] %v350_v2  ;;  %353 = vst [vmem:[%s1534_s1 + $0x4c0] sm:$0xff] %v352_v3  ;;  %v356_v5 = vld [vmem:[%s1533_s0 + $0x4d8] sm:$0xff]  ;;  %v358_v6 = vld [vmem:[%s1533_s0 + $0x4e0] sm:$0xff] }
  0x44   :  { %355 = vst [vmem:[%s1534_s1 + $0x4d0] sm:$0xff] %v354_v4  ;;  %357 = vst [vmem:[%s1534_s1 + $0x4d8] sm:$0xff] %v356_v5  ;;  %v360_v7 = vld [vmem:[%s1533_s0 + $0x4e8] sm:$0xff]  ;;  %v362_v8 = vld [vmem:[%s1533_s0 + $0x4f0] sm:$0xff] }
  0x45   :  { %359 = vst [vmem:[%s1534_s1 + $0x4e0] sm:$0xff] %v358_v6  ;;  %v364_v9 = vld [vmem:[%s1533_s0 + $0x4f8] sm:$0xff]  ;;  %361 = vst [vmem:[%s1534_s1 + $0x4e8] sm:$0xff] %v360_v7  ;;  %v366_v10 = vld [vmem:[%s1533_s0 + $0x508] sm:$0xff] }
  0x46   :  { %363 = vst [vmem:[%s1534_s1 + $0x4f0] sm:$0xff] %v362_v8  ;;  %365 = vst [vmem:[%s1534_s1 + $0x4f8] sm:$0xff] %v364_v9  ;;  %v368_v11 = vld [vmem:[%s1533_s0 + $0x510] sm:$0xff]  ;;  %v370_v12 = vld [vmem:[%s1533_s0 + $0x518] sm:$0xff] }
  0x47   :  { %367 = vst [vmem:[%s1534_s1 + $0x508] sm:$0xff] %v366_v10  ;;  %369 = vst [vmem:[%s1534_s1 + $0x510] sm:$0xff] %v368_v11  ;;  %v372_v13 = vld [vmem:[%s1533_s0 + $0x520] sm:$0xff]  ;;  %v374_v14 = vld [vmem:[%s1533_s0 + $0x528] sm:$0xff] }
  0x48   :  { %371 = vst [vmem:[%s1534_s1 + $0x518] sm:$0xff] %v370_v12  ;;  %v376_v15 = vld [vmem:[%s1533_s0 + $0x530] sm:$0xff]  ;;  %373 = vst [vmem:[%s1534_s1 + $0x520] sm:$0xff] %v372_v13  ;;  %v466_v17 = vld [vmem:[%s1533_s0 + $0x68] sm:$0x1] }
  0x49   :  { %375 = vst [vmem:[%s1534_s1 + $0x528] sm:$0xff] %v374_v14  ;;  %377 = vst [vmem:[%s1534_s1 + $0x530] sm:$0xff] %v376_v15  ;;  %v464_v16 = vld [vmem:[%s1533_s0 + $0x30] sm:$0x1]  ;;  %v468_v18 = vld [vmem:[%s1533_s0 + $0xa0] sm:$0x1] }
  0x4a   :  { %465 = vst [vmem:[%s1534_s1 + $0x30] sm:$0x1] %v464_v16  ;;  %467 = vst [vmem:[%s1534_s1 + $0x68] sm:$0x1] %v466_v17  ;;  %v470_v19 = vld [vmem:[%s1533_s0 + $0xd8] sm:$0x1] }
  0x4b   :  { %469 = vst [vmem:[%s1534_s1 + $0xa0] sm:$0x1] %v468_v18  ;;  %v472_v20 = vld [vmem:[%s1533_s0 + $0x110] sm:$0x1]  ;;  %v474_v21 = vld [vmem:[%s1533_s0 + $0x148] sm:$0x1] }
  0x4c   :  { %471 = vst [vmem:[%s1534_s1 + $0xd8] sm:$0x1] %v470_v19  ;;  %473 = vst [vmem:[%s1534_s1 + $0x110] sm:$0x1] %v472_v20  ;;  %v476_v22 = vld [vmem:[%s1533_s0 + $0x180] sm:$0x1] }
  0x4d   :  { %475 = vst [vmem:[%s1534_s1 + $0x148] sm:$0x1] %v474_v21  ;;  %v478_v23 = vld [vmem:[%s1533_s0 + $0x1b8] sm:$0x1]  ;;  %v480_v24 = vld [vmem:[%s1533_s0 + $0x1f0] sm:$0x1] }
  0x4e   :  { %477 = vst [vmem:[%s1534_s1 + $0x180] sm:$0x1] %v476_v22  ;;  %479 = vst [vmem:[%s1534_s1 + $0x1b8] sm:$0x1] %v478_v23  ;;  %v482_v25 = vld [vmem:[%s1533_s0 + $0x228] sm:$0x1] }
  0x4f   :  { %481 = vst [vmem:[%s1534_s1 + $0x1f0] sm:$0x1] %v480_v24  ;;  %v484_v26 = vld [vmem:[%s1533_s0 + $0x260] sm:$0x1]  ;;  %v486_v27 = vld [vmem:[%s1533_s0 + $0x298] sm:$0x1] }
  0x50   :  { %483 = vst [vmem:[%s1534_s1 + $0x228] sm:$0x1] %v482_v25  ;;  %485 = vst [vmem:[%s1534_s1 + $0x260] sm:$0x1] %v484_v26  ;;  %v488_v28 = vld [vmem:[%s1533_s0 + $0x2d0] sm:$0x1] }
  0x51   :  { %487 = vst [vmem:[%s1534_s1 + $0x298] sm:$0x1] %v486_v27  ;;  %v490_v29 = vld [vmem:[%s1533_s0 + $0x308] sm:$0x1]  ;;  %v492_v30 = vld [vmem:[%s1533_s0 + $0x340] sm:$0x1] }
  0x52   :  { %489 = vst [vmem:[%s1534_s1 + $0x2d0] sm:$0x1] %v488_v28  ;;  %491 = vst [vmem:[%s1534_s1 + $0x308] sm:$0x1] %v490_v29  ;;  %v494_v31 = vld [vmem:[%s1533_s0 + $0x378] sm:$0x1] }
  0x53   :  { %493 = vst [vmem:[%s1534_s1 + $0x340] sm:$0x1] %v492_v30  ;;  %v496_v32 = vld [vmem:[%s1533_s0 + $0x3b0] sm:$0x1]  ;;  %v498_v33 = vld [vmem:[%s1533_s0 + $0x3e8] sm:$0x1] }
  0x54   :  { %495 = vst [vmem:[%s1534_s1 + $0x378] sm:$0x1] %v494_v31  ;;  %497 = vst [vmem:[%s1534_s1 + $0x3b0] sm:$0x1] %v496_v32  ;;  %v500_v34 = vld [vmem:[%s1533_s0 + $0x420] sm:$0x1] }
  0x55   :  { %499 = vst [vmem:[%s1534_s1 + $0x3e8] sm:$0x1] %v498_v33  ;;  %v502_v35 = vld [vmem:[%s1533_s0 + $0x458] sm:$0x1]  ;;  %v504_v36 = vld [vmem:[%s1533_s0 + $0x490] sm:$0x1] }
  0x56   :  { %501 = vst [vmem:[%s1534_s1 + $0x420] sm:$0x1] %v500_v34  ;;  %503 = vst [vmem:[%s1534_s1 + $0x458] sm:$0x1] %v502_v35  ;;  %v506_v37 = vld [vmem:[%s1533_s0 + $0x4c8] sm:$0x1] }
  0x57   :  { %505 = vst [vmem:[%s1534_s1 + $0x490] sm:$0x1] %v504_v36  ;;  %v508_v38 = vld [vmem:[%s1533_s0 + $0x500] sm:$0x1]  ;;  %v510_v39 = vld [vmem:[%s1533_s0 + $0x538] sm:$0x1] }
  0x58   :  { %507 = vst [vmem:[%s1534_s1 + $0x4c8] sm:$0x1] %v506_v37  ;;  %509 = vst [vmem:[%s1534_s1 + $0x500] sm:$0x1] %v508_v38 }
  0x59   :  { %511 = vst [vmem:[%s1534_s1 + $0x538] sm:$0x1] %v510_v39 }
  0x5a   :  { %439 = vsyncadd [#allocation2], 18816 }
  0x5b   :  { %513 = dma.done.wait [#allocation2], 18816 }
  0x5c   :  { %514 = vsyncadd [#allocation2], 4294948480 }
  0x5d   :  { %444 = vsyncmov [#allocation2] }
  0x60   :  { %s445_s11 = vpop.sfrf %444 }
  0x61   :  { %p512_p0 = scmp.ne.s32.totalorder %s445_s11, 0 }
  0x63   :  { %449 = shalt.err (%p512_p0)  }

</bundles_post_ra>
